<compile_context>
chip_gen: v7x
topology: tpu7x:2x2x1
jax: 0.10.0
libtpu: 0.0.40
codegen_flags: <defaults>
</compile_context>

<pallas_src>
import functools

import jax
import jax.numpy as jnp
from jax.experimental import pallas as pl
from jax.experimental.pallas import tpu as pltpu

DROP_P = 0.5                       # F.dropout default
KEEP_SCALE = 1.0 / (1.0 - DROP_P)  # inverted-dropout scale
# keep iff hash >= DROP_P * 2^32  ->  P(keep) = 1 - DROP_P
_DROP_THRESH = int(DROP_P * 4294967296) & 0xFFFFFFFF


def _round_up(a, b):
    return (a + b - 1) // b * b


def _dropout_mask(shape, seed_u32, row_offset, salt):
    """Deterministic Bernoulli(1-p) keep-mask * 1/(1-p).

    Depends only on (seed, global row index, column index, salt), so row tiles
    get independent masks and results are invariant to the tile size.
    Uses only VPU integer ops (iota / mul / xor / shift) -> portable & cheap.
    """
    rows = (jax.lax.broadcasted_iota(jnp.int32, shape, 0) + row_offset).astype(jnp.uint32)
    cols = jax.lax.broadcasted_iota(jnp.int32, shape, 1).astype(jnp.uint32)
    h = rows * jnp.uint32(0x9E3779B1) + cols * jnp.uint32(0x85EBCA77)
    h = h ^ (seed_u32 + jnp.uint32(salt) * jnp.uint32(0xC2B2AE3D))
    # murmur3-style finalizer for avalanche
    h = h ^ (h >> 16)
    h = h * jnp.uint32(0x7FEB352D)
    h = h ^ (h >> 15)
    h = h * jnp.uint32(0x846CA68B)
    h = h ^ (h >> 16)
    keep = (h >= jnp.uint32(_DROP_THRESH)).astype(jnp.float32)
    return keep * KEEP_SCALE


def hidden_layer_kernel(seed_ref, x_ref, w1_ref, b1_ref, w2_ref, b2_ref,
                        out_ref, *, training, tm):
    x = x_ref[...].astype(jnp.float32)

    if training:
        seed_u32 = seed_ref[0].astype(jnp.uint32)
        row0 = pl.program_id(0) * tm                # global row offset of this tile
        x = x * _dropout_mask(x.shape, seed_u32, row0, salt=1)

    # Linear1 + ReLU (MXU matmul, f32 accumulation)
    h = jnp.dot(x, w1_ref[...], preferred_element_type=jnp.float32) + b1_ref[...]
    h = jnp.maximum(h, 0.0)

    if training:
        h = h * _dropout_mask(h.shape, seed_u32, row0, salt=2)

    # Linear2
    out = jnp.dot(h, w2_ref[...], preferred_element_type=jnp.float32) + b2_ref[...]
    out_ref[...] = out.astype(out_ref.dtype)


def hidden_layer_forward(features, w1, b1, w2, b2, *, seed=0, training=True):
    """features: (..., feature_dim) -> (..., tag_dim)."""
    orig_shape = features.shape
    K = orig_shape[-1]
    x2d = features.reshape(-1, K)
    M = x2d.shape[0]
    H = w1.shape[1]
    T = w2.shape[1]

    # Lane-dense output: pad tag_dim up to a multiple of 128 (matters for
    # is_spc=True where T=2 would force masked partial stores).
    T_pad = _round_up(T, 128)
    if T_pad != T:
        w2 = jnp.pad(w2, ((0, 0), (0, T_pad - T)))
        b2 = jnp.pad(b2, (0, T_pad - T))

    # Row tile: largest of up to 512 rows (mem-bound kernel -> big tiles),
    # multiple of 8 for the f32 sublane constraint.
    tm = min(512, _round_up(M, 8))
    M_pad = _round_up(M, tm)
    if M_pad != M:
        x2d = jnp.pad(x2d, ((0, M_pad - M), (0, 0)))

    grid = (pl.cdiv(M_pad, tm),)
    seed_arr = jnp.array([seed], dtype=jnp.int32)
    kernel = functools.partial(hidden_layer_kernel, training=training, tm=tm)

    flops = 2 * M_pad * (K * H + H * T_pad)
    bytes_accessed = 4 * (M_pad * K + M_pad * T_pad + K * H + H * T_pad + H + T_pad)

    out = pl.pallas_call(
        kernel,
        out_shape=jax.ShapeDtypeStruct((M_pad, T_pad), features.dtype),
        grid=grid,
        in_specs=[
            pl.BlockSpec(memory_space=pltpu.MemorySpace.SMEM),       # seed scalar
            pl.BlockSpec((tm, K), lambda i: (i, 0)),                 # x row tile
            pl.BlockSpec((K, H), lambda i: (0, 0)),                  # w1 (resident)
            pl.BlockSpec((1, H), lambda i: (0, 0)),                  # b1 (resident)
            pl.BlockSpec((H, T_pad), lambda i: (0, 0)),              # w2 (resident)
            pl.BlockSpec((1, T_pad), lambda i: (0, 0)),              # b2 (resident)
        ],
        out_specs=pl.BlockSpec((tm, T_pad), lambda i: (i, 0)),
        compiler_params=pltpu.CompilerParams(
            dimension_semantics=("parallel",)),
        cost_estimate=pl.CostEstimate(
            flops=flops, transcendentals=0, bytes_accessed=bytes_accessed),
    )(seed_arr, x2d, w1, b1.reshape(1, H), w2, b2.reshape(1, T_pad))

    out = out[:M, :T]
    return out.reshape(orig_shape[:-1] + (T,))


if __name__ == "__main__":
    # Config implied by HiddenLayer.__init__:
    embed_dim = 32
    conv_layer_len = 4
    vocab_out_len = 128
    is_spc = False

    feature_dim = embed_dim * conv_layer_len                        # 128
    hidden_dim = (embed_dim * conv_layer_len + vocab_out_len) // 2  # 128
    tag_dim = 2 if is_spc else vocab_out_len                        # 128

    batch, seq = 2, 8

    key = jax.random.PRNGKey(0)
    kx, kw1, kb1, kw2, kb2 = jax.random.split(key, 5)

    features = jax.random.normal(kx, (batch, seq, feature_dim), dtype=jnp.float32)

    # PyTorch-style Linear init: U(-1/sqrt(fan_in), 1/sqrt(fan_in)), stored (in, out).
    bound1 = 1.0 / (feature_dim ** 0.5)
    w1 = jax.random.uniform(kw1, (feature_dim, hidden_dim), jnp.float32, -bound1, bound1)
    b1 = jax.random.uniform(kb1, (hidden_dim,), jnp.float32, -bound1, bound1)
    bound2 = 1.0 / (hidden_dim ** 0.5)
    w2 = jax.random.uniform(kw2, (hidden_dim, tag_dim), jnp.float32, -bound2, bound2)
    b2 = jax.random.uniform(kb2, (tag_dim,), jnp.float32, -bound2, bound2)

    # Eval-mode (dropout = identity) check against a pure-JAX reference.
    out_eval = hidden_layer_forward(features, w1, b1, w2, b2, training=False)
    jax.block_until_ready(out_eval)
    ref = jnp.maximum(features.reshape(-1, feature_dim) @ w1 + b1, 0.0) @ w2 + b2
    ref = ref.reshape(batch, seq, tag_dim)
    assert out_eval.shape == (batch, seq, tag_dim)
    assert jnp.allclose(out_eval, ref, atol=1e-4, rtol=1e-4)

    # Training-mode run (F.dropout default training=True), deterministic seed.
    # TODO(synk): dropout uses a deterministic hash-based Bernoulli mask rather
    # than torch's RNG stream (statistically equivalent, not bit-identical).
    out_train = hidden_layer_forward(features, w1, b1, w2, b2, seed=1234, training=True)
    jax.block_until_ready(out_train)
    assert out_train.shape == (batch, seq, tag_dim)
    assert bool(jnp.all(jnp.isfinite(out_train)))

    print("KERNEL_OK")
</pallas_src>

<mosaic_0001>
module attributes {stable_mosaic.version = 11 : i64} {
  func.func @hidden_layer_kernel(%arg0: i32, %arg1: memref<1xi32, #tpu.memory_space<smem>>, %arg2: memref<16x128xf32, #tpu.memory_space<vmem>>, %arg3: memref<128x128xf32, #tpu.memory_space<vmem>>, %arg4: memref<1x128xf32, #tpu.memory_space<vmem>>, %arg5: memref<128x128xf32, #tpu.memory_space<vmem>>, %arg6: memref<1x128xf32, #tpu.memory_space<vmem>>, %arg7: memref<16x128xf32, #tpu.memory_space<vmem>>) attributes {dimension_semantics = [#tpu.dimension_semantics<parallel>], iteration_bounds = array<i64: 1>, scalar_prefetch = 0 : i64, scratch_operands = 0 : i64, tpu.core_type = #tpu.core_type<tc>, window_params = [{transform_indices = @transform_0, window_bounds = array<i64: 1>}, {transform_indices = @transform_1, window_bounds = array<i64: 16, 128>}, {pipeline_mode = #tpu.pipeline_mode<synchronous>, transform_indices = @transform_2, window_bounds = array<i64: 128, 128>}, {pipeline_mode = #tpu.pipeline_mode<synchronous>, transform_indices = @transform_3, window_bounds = array<i64: 1, 128>}, {pipeline_mode = #tpu.pipeline_mode<synchronous>, transform_indices = @transform_4, window_bounds = array<i64: 128, 128>}, {pipeline_mode = #tpu.pipeline_mode<synchronous>, transform_indices = @transform_5, window_bounds = array<i64: 1, 128>}, {transform_indices = @transform_6, window_bounds = array<i64: 16, 128>}]} {
    %c0 = arith.constant 0 : index
    %c0_0 = arith.constant 0 : index
    %0 = vector.load %arg2[%c0, %c0_0] : memref<16x128xf32, #tpu.memory_space<vmem>>, vector<16x128xf32>
    %c0_1 = arith.constant 0 : index
    %c0_2 = arith.constant 0 : index
    %1 = vector.load %arg3[%c0_1, %c0_2] : memref<128x128xf32, #tpu.memory_space<vmem>>, vector<128x128xf32>
    %cst = arith.constant dense<0.000000e+00> : vector<16x128xf32>
    %2 = tpu.matmul %0, %1, %cst {dimension_numbers = #tpu.dot_dimension_numbers<[1], [0], [0], [1], [0, 0, 1, 1], [], []>} : vector<16x128xf32>, vector<128x128xf32>, vector<16x128xf32> -> vector<16x128xf32>
    %c0_3 = arith.constant 0 : index
    %c0_4 = arith.constant 0 : index
    %3 = vector.load %arg4[%c0_3, %c0_4] : memref<1x128xf32, #tpu.memory_space<vmem>>, vector<1x128xf32>
    %4 = vector.broadcast %3 : vector<1x128xf32> to vector<16x128xf32>
    %5 = arith.addf %2, %4 : vector<16x128xf32>
    %cst_5 = arith.constant 0.000000e+00 : f32
    %6 = vector.broadcast %cst_5 : f32 to vector<16x128xf32>
    %7 = arith.maximumf %5, %6 : vector<16x128xf32>
    %c0_6 = arith.constant 0 : index
    %c0_7 = arith.constant 0 : index
    %8 = vector.load %arg5[%c0_6, %c0_7] : memref<128x128xf32, #tpu.memory_space<vmem>>, vector<128x128xf32>
    %cst_8 = arith.constant dense<0.000000e+00> : vector<16x128xf32>
    %9 = tpu.matmul %7, %8, %cst_8 {dimension_numbers = #tpu.dot_dimension_numbers<[1], [0], [0], [1], [0, 0, 1, 1], [], []>} : vector<16x128xf32>, vector<128x128xf32>, vector<16x128xf32> -> vector<16x128xf32>
    %c0_9 = arith.constant 0 : index
    %c0_10 = arith.constant 0 : index
    %10 = vector.load %arg6[%c0_9, %c0_10] : memref<1x128xf32, #tpu.memory_space<vmem>>, vector<1x128xf32>
    %11 = vector.broadcast %10 : vector<1x128xf32> to vector<16x128xf32>
    %12 = arith.addf %9, %11 : vector<16x128xf32>
    %c0_11 = arith.constant 0 : index
    %c0_12 = arith.constant 0 : index
    %13 = vector.load %arg7[%c0_11, %c0_12] : memref<16x128xf32, #tpu.memory_space<vmem>>, vector<16x128xf32>
    tpu.vector_store %arg7[%c0_11, %c0_12], %12 {strides = array<i32>} : memref<16x128xf32, #tpu.memory_space<vmem>>, vector<16x128xf32>,
    return
  }
  func.func @transform_0(%arg0: i32) -> i32 {
    %c0_i32 = arith.constant 0 : i32
    %c0_i32_0 = arith.constant 0 : i32
    return %c0_i32 : i32
  }
  func.func @transform_1(%arg0: i32) -> (i32, i32) {
    %c0_i32 = arith.constant 0 : i32
    %c0_i32_0 = arith.constant 0 : i32
    return %arg0, %c0_i32 : i32, i32
  }
  func.func @transform_2(%arg0: i32) -> (i32, i32) {
    %c0_i32 = arith.constant 0 : i32
    %c0_i32_0 = arith.constant 0 : i32
    %c0_i32_1 = arith.constant 0 : i32
    return %c0_i32, %c0_i32_0 : i32, i32
  }
  func.func @transform_3(%arg0: i32) -> (i32, i32) {
    %c0_i32 = arith.constant 0 : i32
    %c0_i32_0 = arith.constant 0 : i32
    %c0_i32_1 = arith.constant 0 : i32
    return %c0_i32, %c0_i32_0 : i32, i32
  }
  func.func @transform_4(%arg0: i32) -> (i32, i32) {
    %c0_i32 = arith.constant 0 : i32
    %c0_i32_0 = arith.constant 0 : i32
    %c0_i32_1 = arith.constant 0 : i32
    return %c0_i32, %c0_i32_0 : i32, i32
  }
  func.func @transform_5(%arg0: i32) -> (i32, i32) {
    %c0_i32 = arith.constant 0 : i32
    %c0_i32_0 = arith.constant 0 : i32
    %c0_i32_1 = arith.constant 0 : i32
    return %c0_i32, %c0_i32_0 : i32, i32
  }
  func.func @transform_6(%arg0: i32) -> (i32, i32) {
    %c0_i32 = arith.constant 0 : i32
    %c0_i32_0 = arith.constant 0 : i32
    return %arg0, %c0_i32 : i32, i32
  }
}

</mosaic_0001>

<bundles_post_ra>
// kernel: tpu_custom_call.1
= control target key start
LH: loop header
LB: loop body
LE: loop exit
PB: predicated region body
PF: predicated region fallthrough
CT: control target
= control target key end

     0   :  { %12 = vsyncpa [#allocation4], 0  ;;  %s672_s0 = inlined_call_operand.<no memory space> [shape: s32[1], index: 0, kind: input, shape index: {}]   ;;  %s673_s1 = inlined_call_operand.hbm [shape: f32[16,128], index: 1, kind: input, shape index: {}]   ;;  %s674_s2 = inlined_call_operand.hbm [shape: f32[128,128], index: 2, kind: input, shape index: {}]   ;;  %s675_s3 = inlined_call_operand.vmem [shape: f32[1,128], index: 3, kind: input, shape index: {}]   ;;  %s676_s4 = inlined_call_operand.hbm [shape: f32[128,128], index: 4, kind: input, shape index: {}]   ;;  %s677_s5 = inlined_call_operand.vmem [shape: f32[1,128], index: 5, kind: input, shape index: {}]   ;;  %s678_s6 = inlined_call_operand.hbm [shape: f32[16,128], index: 6, kind: output, shape index: {}]  }
   0x1   :  { %13 = vsyncpa [#allocation7], 0 }
   0x2   :  { %14 = vsyncpa [#allocation5], 0  ;;  %s558_s0 = smov [#allocation6]   ;;  %s559_s22 = smov [#allocation3]  }
   0x3   :  { %s34_s21 = sshll.u32 %s558_s0, 4  ;;  %s22_s23 = sshll.u32 %s559_s22, 4  ;;  %s35_s21 = int_to_ptr.vmem [resolvable:$true] %s34_s21  ;;  %s599_s23 = int_to_ptr.vmem [resolvable:$true] %s22_s23 }
   0x4   :  { %s464_s26 = scalar_lea.hbm %s674_s2, 2048 }
   0x5   :  { %p465_p0 = scmp.ne.s32.totalorder %s674_s2, %s464_s26  ;;  %p468_p1 = scmp.lt.u32.totalorder %s464_s26, %s674_s2 }
   0x7   :  { %p470_p2 = pnand %p468_p1, %p465_p0 }
   0x9   :  { %473 = shalt.err (!%p470_p2)
}
   0xa   :  { %s474_s7 = scalar_lea.vmem %s35_s21, 2048  ;;  %p479_p4 = scmp.lt.s32.totalorder %s35_s21, %s35_s21 }
   0xb   :  { %p475_p3 = scmp.ne.s32.totalorder %s35_s21, %s474_s7  ;;  %p480_p5 = scmp.lt.s32.totalorder %s474_s7, %s474_s7 }
   0xd   :  { %p481_p6 = por %p480_p5, %p479_p4 }
   0xf   :  { %p482_p7 = pnand %p481_p6, %p475_p3 }
  0x11   :  { %485 = shalt.err (!%p482_p7)
}
  0x12   :  { %s560_s8 = smov 128   ;;  %s561_s9 = smov 8  }
  0x13   :  { %40 = dma.hbm_to_vmem [thread:$0]  %s674_s2, 2048, %s35_s21, [#allocation7], %s560_s8, %s560_s8, %s561_s9  }
  0x14   :  { %s486_s14 = scalar_lea.hbm %s673_s1, 256 }
  0x15   :  { %p487_p8 = scmp.ne.s32.totalorder %s673_s1, %s486_s14  ;;  %p490_p9 = scmp.lt.u32.totalorder %s486_s14, %s673_s1 }
  0x17   :  { %p492_p10 = pnand %p490_p9, %p487_p8 }
  0x19   :  { %495 = shalt.err (!%p492_p10)
}
  0x1a   :  { %s496_s19 = scalar_lea.vmem %s599_s23, 256  ;;  %p501_p12 = scmp.lt.s32.totalorder %s599_s23, %s599_s23 }
  0x1b   :  { %p497_p11 = scmp.ne.s32.totalorder %s599_s23, %s496_s19  ;;  %p502_p13 = scmp.lt.s32.totalorder %s496_s19, %s496_s19 }
  0x1d   :  { %p503_p0 = por %p502_p13, %p501_p12 }
  0x1f   :  { %p504_p1 = pnand %p503_p0, %p497_p11 }
  0x21   :  { %507 = shalt.err (!%p504_p1)
}
  0x22   :  { %28 = dma.hbm_to_vmem [thread:$0]  %s673_s1, 256, %s599_s23, [#allocation4], %s560_s8, %s560_s8, %s561_s9  }
  0x23   :  { %s562_s0 = smov [#allocation8]   ;;  %s508_s25 = scalar_lea.hbm %s676_s4, 2048 }
  0x24   :  { %s48_s21 = sshll.u32 %s562_s0, 4  ;;  %p509_p2 = scmp.ne.s32.totalorder %s676_s4, %s508_s25  ;;  %s49_s21 = int_to_ptr.vmem [resolvable:$true] %s48_s21 }
  0x25   :  { %p512_p3 = scmp.lt.u32.totalorder %s508_s25, %s676_s4 }
  0x27   :  { %p514_p4 = pnand %p512_p3, %p509_p2 }
  0x29   :  { %517 = shalt.err (!%p514_p4)
}
  0x2a   :  { %s518_s30 = scalar_lea.vmem %s49_s21, 2048  ;;  %p523_p6 = scmp.lt.s32.totalorder %s49_s21, %s49_s21 }
  0x2b   :  { %p519_p5 = scmp.ne.s32.totalorder %s49_s21, %s518_s30  ;;  %p524_p7 = scmp.lt.s32.totalorder %s518_s30, %s518_s30 }
  0x2d   :  { %p525_p8 = por %p524_p7, %p523_p6 }
  0x2f   :  { %p526_p9 = pnand %p525_p8, %p519_p5 }
  0x31   :  { %529 = shalt.err (!%p526_p9)
}
  0x32   :  { %54 = dma.hbm_to_vmem [thread:$0]  %s676_s4, 2048, %s49_s21, [#allocation7], %s560_s8, %s560_s8, %s561_s9  }
  0x33   :  { %552 = dma.done.wait [#allocation4], 256  }
  0x34   :  { %553 = vsyncadd [#allocation4], 4294967040 }
  0x35   :  { %554 = dma.done.wait [#allocation7], 4096  }
  0x36   :  { %555 = vsyncadd [#allocation7], 4294963200  ;;  %v68_v0 = vld [vmem:[#allocation6] sm:$0xff]  ;;  %v69_v1 = vld [vmem:[#allocation6 + $0x8] sm:$0xff]  ;;  %s563_s12 = smov [#allocation9]  }
  0x37   :  { %v70_v2 = vld [vmem:[#allocation6 + $0x10] sm:$0xff]  ;;  %v394_v3 = vpack.c.bf16 %v69_v1, %v68_v0  ;;  %v71_v4 = vld [vmem:[#allocation6 + $0x18] sm:$0xff]  ;;  %v72_v6 = vld [vmem:[#allocation6 + $0x20] sm:$0xff]  ;;  %s273_s13 = sshll.u32 %s563_s12, 4  ;;  %s274_s13 = int_to_ptr.vmem [resolvable:$true] %s273_s13 }
  0x38   :  { %v398_v5 = vpack.c.bf16 %v71_v4, %v70_v2  ;;  %v73_v7 = vld [vmem:[#allocation6 + $0x28] sm:$0xff]  ;;  %v74_v9 = vld [vmem:[#allocation6 + $0x30] sm:$0xff]  ;;  %v75_v10 = vld [vmem:[#allocation6 + $0x38] sm:$0xff]  ;;  %p535_p11 = scmp.lt.s32.totalorder %s274_s13, %s274_s13 }
  0x39   :  { %395 = vmatprep.subr.bf16.mxu0 %v394_v3  ;;  %v402_v8 = vpack.c.bf16 %v73_v7, %v72_v6  ;;  %v66_v11 = vld [vmem:[#allocation3] sm:$0xff]  ;;  %v168_v12 = vld [vmem:[#allocation8] sm:$0xff]  ;;  %v169_v13 = vld [vmem:[#allocation8 + $0x8] sm:$0xff]  ;;  %v406_v20 = vpack.c.bf16 %v75_v10, %v74_v9 }
  0x3a   :  { %397 = vmatpush3.bf16.msra.mxu0 %v394_v3  ;;  %356 = vmatprep.mubr.f32.mxu0 %v66_v11  ;;  %v170_v14 = vld [vmem:[#allocation8 + $0x10] sm:$0xff]  ;;  %v426_v15 = vpack.c.bf16 %v169_v13, %v168_v12  ;;  %v171_v16 = vld [vmem:[#allocation8 + $0x18] sm:$0xff]  ;;  %v172_v18 = vld [vmem:[#allocation8 + $0x20] sm:$0xff] }
  0x3b   :  { %399 = vmatprep.subr.bf16.mxu0 %v398_v5  ;;  %v430_v17 = vpack.c.bf16 %v171_v16, %v170_v14  ;;  %v173_v19 = vld [vmem:[#allocation8 + $0x28] sm:$0xff]  ;;  %v76_v21 = vld [vmem:[#allocation6 + $0x40] sm:$0xff]  ;;  %v174_v24 = vld [vmem:[#allocation8 + $0x30] sm:$0xff] }
  0x3c   :  { %427 = vmatprep.subr.bf16.mxu1 %v426_v15  ;;  %v77_v22 = vld [vmem:[#allocation6 + $0x48] sm:$0xff]  ;;  %v434_v23 = vpack.c.bf16 %v173_v19, %v172_v18  ;;  %v175_v25 = vld [vmem:[#allocation8 + $0x38] sm:$0xff]  ;;  %v78_v27 = vld [vmem:[#allocation6 + $0x50] sm:$0xff] }
  0x3d   :  { %429 = vmatpush3.bf16.msra.mxu1 %v426_v15  ;;  %v410_v26 = vpack.c.bf16 %v77_v22, %v76_v21  ;;  %v79_v28 = vld [vmem:[#allocation6 + $0x58] sm:$0xff]  ;;  %v438_v29 = vpack.c.bf16 %v175_v25, %v174_v24  ;;  %v176_v30 = vld [vmem:[#allocation8 + $0x40] sm:$0xff]  ;;  %v177_v31 = vld [vmem:[#allocation8 + $0x48] sm:$0xff] }
  0x3e   :  { %401 = vmatpush3.bf16.msra.mxu0 %v398_v5  ;;  %431 = vmatprep.subr.bf16.mxu1 %v430_v17  ;;  %v414_v32 = vpack.c.bf16 %v79_v28, %v78_v27  ;;  %v80_v33 = vld [vmem:[#allocation6 + $0x60] sm:$0xff]  ;;  %v81_v34 = vld [vmem:[#allocation6 + $0x68] sm:$0xff]  ;;  %v442_v35 = vpack.c.bf16 %v177_v31, %v176_v30  ;;  %v178_v36 = vld [vmem:[#allocation8 + $0x50] sm:$0xff] }
  0x3f   :  { %403 = vmatprep.subr.bf16.mxu0 %v402_v8  ;;  %v179_v37 = vld [vmem:[#allocation8 + $0x58] sm:$0xff]  ;;  %v418_v38 = vpack.c.bf16 %v81_v34, %v80_v33  ;;  %v82_v39 = vld [vmem:[#allocation6 + $0x70] sm:$0xff]  ;;  %v180_v42 = vld [vmem:[#allocation8 + $0x60] sm:$0xff] }
  0x40   :  { %v83_v40 = vld [vmem:[#allocation6 + $0x78] sm:$0xff]  ;;  %v446_v41 = vpack.c.bf16 %v179_v37, %v178_v36  ;;  %v181_v43 = vld [vmem:[#allocation8 + $0x68] sm:$0xff]  ;;  %v182_v47 = vld [vmem:[#allocation8 + $0x70] sm:$0xff] }
  0x41   :  { %433 = vmatpush3.bf16.msra.mxu1 %v430_v17  ;;  %v422_v44 = vpack.c.bf16 %v83_v40, %v82_v39  ;;  %v450_v45 = vpack.c.bf16 %v181_v43, %v180_v42  ;;  %v67_v46 = vld [vmem:[#allocation3 + $0x8] sm:$0xff]  ;;  %v286_v50 = vld [vmem:[%s675_s3] ss:$0 sm:$0xff]  ;;  %s530_s3 = scalar_lea.vmem %s274_s13, 256 }
  0x42   :  { %405 = vmatpush3.bf16.msra.mxu0 %v402_v8  ;;  %435 = vmatprep.subr.bf16.mxu1 %v434_v23  ;;  %v183_v48 = vld [vmem:[#allocation8 + $0x78] sm:$0xff]  ;;  %v287_v57 = vld [vmem:[%s677_s5] ss:$0 sm:$0xff]  ;;  %p531_p10 = scmp.ne.s32.totalorder %s274_s13, %s530_s3  ;;  %p536_p12 = scmp.lt.s32.totalorder %s530_s3, %s530_s3 }
  0x43   :  { %407 = vmatprep.subr.bf16.mxu0 %v406_v20  ;;  %v454_v49 = vpack.c.bf16 %v183_v48, %v182_v47 }
  0x44   :  { %p537_p13 = por %p536_p12, %p535_p11 }
  0x45   :  { %437 = vmatpush3.bf16.msra.mxu1 %v434_v23 }
  0x46   :  { %409 = vmatpush3.bf16.msra.mxu0 %v406_v20  ;;  %439 = vmatprep.subr.bf16.mxu1 %v438_v29  ;;  %p538_p0 = pnand %p537_p13, %p531_p10 }
  0x47   :  { %411 = vmatprep.subr.bf16.mxu0 %v410_v26 }
  0x49   :  { %441 = vmatpush3.bf16.msra.mxu1 %v438_v29 }
  0x4a   :  { %413 = vmatpush3.bf16.msra.mxu0 %v410_v26  ;;  %443 = vmatprep.subr.bf16.mxu1 %v442_v35 }
  0x4b   :  { %415 = vmatprep.subr.bf16.mxu0 %v414_v32 }
  0x4d   :  { %445 = vmatpush3.bf16.msra.mxu1 %v442_v35 }
  0x4e   :  { %417 = vmatpush3.bf16.msra.mxu0 %v414_v32  ;;  %447 = vmatprep.subr.bf16.mxu1 %v446_v41 }
  0x4f   :  { %419 = vmatprep.subr.bf16.mxu0 %v418_v38 }
  0x51   :  { %449 = vmatpush3.bf16.msra.mxu1 %v446_v41 }
  0x52   :  { %421 = vmatpush3.bf16.msra.mxu0 %v418_v38  ;;  %451 = vmatprep.subr.bf16.mxu1 %v450_v45 }
  0x53   :  { %423 = vmatprep.subr.bf16.mxu0 %v422_v44 }
  0x55   :  { %453 = vmatpush3.bf16.msra.mxu1 %v450_v45 }
  0x56   :  { %425 = vmatpush3.bf16.msra.mxu0 %v422_v44  ;;  %455 = vmatprep.subr.bf16.mxu1 %v454_v49 }
  0x59   :  { %357 = vmatmul.mubr.f32.vlgmr.msra.gmra.mrb[0].mxu0 %v67_v46  ;;  %457 = vmatpush3.bf16.msra.mxu1 %v454_v49 }
 0x12c   :  { %v358_v51 = vpop.f32.mrb[0].mxu0 }
 0x12d   :  { %v163_v52 = vadd.f32 %v358_v51, %v286_v50  ;;  %v157_v53 = vpop.f32.mrb[1].mxu0 }
 0x12e   :  { %v158_v54 = vadd.f32 %v286_v50, %v157_v53 }
 0x12f   :  { %v167_v56 = vmax.f32 %v163_v52, 0.0 }
 0x130   :  { %v166_v55 = vmax.f32 %v158_v54, 0.0 }
 0x132   :  { %391 = vmatprep.mubr.f32.mxu1 %v166_v55 }
 0x133   :  { %392 = vmatmul.mubr.f32.vlgmr.msra.gmra.mrb[0].mxu1 %v167_v56 }
 0x206   :  { %v393_v58 = vpop.f32.mrb[0].mxu1 }
 0x207   :  { %v263_v59 = vadd.f32 %v393_v58, %v287_v57  ;;  %v257_v60 = vpop.f32.mrb[1].mxu1 }
 0x208   :  { %v258_v61 = vadd.f32 %v287_v57, %v257_v60 }
 0x209   :  { %267 = vst [vmem:[#allocation9 + $0x8] sm:$0xff] %v263_v59 }
 0x20a   :  { %266 = vst [vmem:[#allocation9] sm:$0xff] %v258_v61 }
 0x20b   :  { %541 = shalt.err (!%p538_p0)
}
 0x20c   :  { %s542_s5 = scalar_lea.hbm %s678_s6, 256 }
 0x20d   :  { %p543_p1 = scmp.ne.s32.totalorder %s678_s6, %s542_s5  ;;  %p546_p2 = scmp.lt.u32.totalorder %s542_s5, %s678_s6 }
 0x20f   :  { %p548_p3 = pnand %p546_p2, %p543_p1 }
 0x211   :  { %551 = shalt.err (!%p548_p3)
}
 0x212   :  { %279 = dma.vmem_to_hbm [thread:$0]  %s274_s13, 256, %s678_s6, [#allocation5], %s560_s8, %s560_s8, %s561_s9  }
 0x213   :  { %556 = dma.done.wait [#allocation5], 256  }
 0x214   :  { %557 = vsyncadd [#allocation5], 4294967040 }
 0x215   :  { %283 = vsyncpa [#allocation4], 1 }
 0x216   :  { %284 = vsyncpa [#allocation7], 1 }
 0x217   :  { %285 = vsyncpa [#allocation5], 1 }

</bundles_post_ra>
